<compile_context>
chip_gen: v7x
topology: tpu7x:2x2x1
jax: 0.10.0
libtpu: 0.0.40
codegen_flags: <defaults>
</compile_context>

<pallas_src>
import functools

import jax
import jax.numpy as jnp
from jax.experimental import pallas as pl
from jax.experimental.pallas import tpu as pltpu

LN_EPS = 1e-5  # torch.nn.LayerNorm default eps


def _round_up(v, m):
    return ((v + m - 1) // m) * m


def _masked_layernorm(h, n_valid, n_padded):
    """LayerNorm over the first n_valid features of the (zero-padded) last axis.

    Centered two-pass form (matches torch LayerNorm numerics). Padded lanes of
    h are exactly zero, so the plain sum equals the sum over valid features;
    centered values are re-masked so the variance only sees valid lanes.
    Padded output lanes come out exactly 0.
    """
    inv_n = 1.0 / float(n_valid)
    mu = jnp.sum(h, axis=-1, keepdims=True) * inv_n
    c = h - mu
    if n_valid != n_padded:
        mask = jax.lax.broadcasted_iota(jnp.int32, h.shape, h.ndim - 1) < n_valid
        c = jnp.where(mask, c, 0.0)
    var = jnp.sum(c * c, axis=-1, keepdims=True) * inv_n
    return c * jax.lax.rsqrt(var + LN_EPS)


def _resblock_kernel(x_ref, act_ref, wmain_ref, bmain_ref, wcond_ref, bcond_ref,
                     w2_ref, b2_ref, out_ref, *, H, OUT, Hp, Op, Ap):
    x = x_ref[...].astype(jnp.bfloat16)          # [TB, INp]  (bf16 MXU path)
    act = act_ref[...]                           # [TB, 1] int32
    TB = x.shape[0]

    # ---- fused psi_1 + residual-W matmul (same LHS x, single MXU stream) ----
    hw = jnp.dot(x, wmain_ref[...], preferred_element_type=jnp.float32) + bmain_ref[...]
    # Stage residual W(x) in the VMEM-resident output block immediately to
    # shorten its vreg live range across the rest of the body.
    out_ref[...] = hw[:, Hp:].astype(out_ref.dtype)
    h = hw[:, :Hp]                               # psi_1(x)          [TB, Hp]

    # ---- one_hot(action) and fused FiLM conditioning (g1|b1|g2|b2) ----
    iota = jax.lax.broadcasted_iota(jnp.int32, (TB, Ap), 1)
    onehot = (iota == act).astype(jnp.float32)   # [TB, Ap]  (Ap ~ 8)
    cond = jnp.dot(onehot, wcond_ref[...], preferred_element_type=jnp.float32) + bcond_ref[...]
    g1 = cond[:, :Hp]
    bt1 = cond[:, Hp:2 * Hp]
    g2 = cond[:, 2 * Hp:2 * Hp + Op]
    bt2 = cond[:, 2 * Hp + Op:]

    # ---- FiLM1 + ReLU ----
    h = _masked_layernorm(h, H, Hp) * g1 + bt1
    h = jnp.maximum(h, 0.0)

    # ---- psi_2 + FiLM2 ----
    y = jnp.dot(h.astype(jnp.bfloat16), w2_ref[...], preferred_element_type=jnp.float32) + b2_ref[...]
    y = _masked_layernorm(y, OUT, Op) * g2 + bt2

    # ---- add residual (already staged in out_ref) ----
    out_ref[...] = (out_ref[...] + y).astype(out_ref.dtype)


def _pick_batch_tile(B, INp, Hp, Op, x_itemsize, resident_weight_bytes):
    """Largest 8-aligned batch tile fitting a ~40 MiB VMEM budget, capped so
    larger batches keep >= 2 grid steps (megacore on v7x)."""
    budget = 40 << 20
    b_aligned = _round_up(B, 8)
    cap = b_aligned if B <= 16 else _round_up((B + 1) // 2, 8)
    tb = _round_up(min(1024, cap, b_aligned), 8)
    while tb > 8:
        stream = 2 * tb * (INp * x_itemsize + 4 + Op * 4)   # double-buffered x / act / out
        live = 3 * tb * (Hp + Op) * 4                       # intermediates headroom
        if resident_weight_bytes + stream + live <= budget:
            break
        tb -= 8
    return max(8, tb)


def resblock_fc_film(x, action, params):
    """x: [B, in_features] (f32 or bf16), action: [B] int, params: dict (see make_params)."""
    B, IN = x.shape
    H = params["b1"].shape[-1]
    OUT = params["bW"].shape[-1]
    A = params["wc1"].shape[0]

    INp = _round_up(IN, 128)
    Hp = _round_up(H, 128)
    Op = _round_up(OUT, 128)
    Ap = max(8, _round_up(A, 8))   # sublane-aligned is enough; lane dim is 2*(Hp+Op)

    x_itemsize = jnp.dtype(x.dtype).itemsize

    # ---- pack / zero-pad weights (padded lanes stay exactly zero) ----
    def pad2(a, r, c):
        return jnp.pad(a, ((0, r - a.shape[0]), (0, c - a.shape[1])))

    def pad1(a, c):
        a = a.reshape(1, -1)
        return jnp.pad(a, ((0, 0), (0, c - a.shape[-1])))

    w_main = jnp.concatenate(
        [pad2(params["w1"], INp, Hp), pad2(params["wW"], INp, Op)], axis=1
    ).astype(jnp.bfloat16)                                           # [INp, Hp+Op]
    b_main = jnp.concatenate(
        [pad1(params["b1"], Hp), pad1(params["bW"], Op)], axis=1).astype(jnp.float32)

    w2 = pad2(params["w2"], Hp, Op).astype(jnp.bfloat16)             # [Hp, Op]
    b2 = pad1(params["b2"], Op).astype(jnp.float32)

    w_cond = jnp.concatenate(
        [pad2(params["wc1"][:, :H], Ap, Hp), pad2(params["wc1"][:, H:], Ap, Hp),
         pad2(params["wc2"][:, :OUT], Ap, Op), pad2(params["wc2"][:, OUT:], Ap, Op)],
        axis=1).astype(jnp.float32)                                  # [Ap, 2Hp+2Op]
    b_cond = jnp.concatenate(
        [pad1(params["bc1"][:H], Hp), pad1(params["bc1"][H:], Hp),
         pad1(params["bc2"][:OUT], Op), pad1(params["bc2"][OUT:], Op)],
        axis=1).astype(jnp.float32)

    resident_bytes = int(w_main.size * 2 + w2.size * 2 + w_cond.size * 4
                         + (b_main.size + b2.size + b_cond.size) * 4)

    TB = _pick_batch_tile(B, INp, Hp, Op, x_itemsize, resident_bytes)
    Bp = _round_up(B, TB)

    # Keep the caller's x dtype (bf16 callers get halved x traffic); kernel casts.
    x_p = jnp.pad(x, ((0, Bp - B), (0, INp - IN)))
    act_p = jnp.pad(action.astype(jnp.int32).reshape(-1, 1), ((0, Bp - B), (0, 0)))

    kernel = functools.partial(_resblock_kernel, H=H, OUT=OUT, Hp=Hp, Op=Op, Ap=Ap)

    stream = lambda i: (i, 0)        # x / action / out tiles follow the batch grid
    resident = lambda i: (0, 0)      # weights: constant block index -> stay in VMEM

    flops = 2 * Bp * (INp * (Hp + Op) + Hp * Op + Ap * 2 * (Hp + Op))
    bytes_accessed = int(x_p.size * x_itemsize + act_p.size * 4 + Bp * Op * 4 + resident_bytes)

    stream_bytes = 2 * TB * (INp * x_itemsize + 4 + Op * 4)
    live_bytes = 4 * TB * (Hp + Op) * 4
    vmem_limit = int(min(max(2 * (resident_bytes + stream_bytes + live_bytes), 32 << 20),
                         56 << 20))   # stay under v7x's 64 MiB physical VMEM

    def build(weight_pipeline_mode):
        wkw = {} if weight_pipeline_mode is None else {"pipeline_mode": weight_pipeline_mode}
        return pl.pallas_call(
            kernel,
            out_shape=jax.ShapeDtypeStruct((Bp, Op), jnp.float32),
            grid=(Bp // TB,),
            in_specs=[
                pl.BlockSpec((TB, INp), stream),                      # x
                pl.BlockSpec((TB, 1), stream),                        # action
                pl.BlockSpec((INp, Hp + Op), resident, **wkw),        # fused psi_1 | W weights (bf16)
                pl.BlockSpec((1, Hp + Op), resident, **wkw),          # fused biases
                pl.BlockSpec((Ap, 2 * (Hp + Op)), resident, **wkw),   # fused FiLM cond weights
                pl.BlockSpec((1, 2 * (Hp + Op)), resident, **wkw),    # fused FiLM cond biases
                pl.BlockSpec((Hp, Op), resident, **wkw),              # psi_2 weight (bf16)
                pl.BlockSpec((1, Op), resident, **wkw),               # psi_2 bias
            ],
            out_specs=pl.BlockSpec((TB, Op), stream),
            compiler_params=pltpu.CompilerParams(
                dimension_semantics=("parallel",),
                vmem_limit_bytes=vmem_limit),
            cost_estimate=pl.CostEstimate(flops=flops, transcendentals=2 * Bp,
                                          bytes_accessed=bytes_accessed),
        )

    args = (x_p, act_p, w_main, b_main, w_cond, b_cond, w2, b2)
    try:
        # Constant-index weights fetched once -> single-buffer them (halves resident VMEM).
        out_p = jax.block_until_ready(build(pl.Buffered(1))(*args))
    except Exception:
        # Fallback if single-buffered pipeline_mode is rejected by this runtime.
        out_p = jax.block_until_ready(build(None)(*args))

    return out_p[:B, :OUT]


def make_params(key, in_features, hidden_features, out_features, action_features):
    """Deterministic synthetic init, weight layout [in, out] (transposed vs torch)."""
    ks = jax.random.split(key, 10)

    def w(k, fi, fo):
        return jax.random.normal(k, (fi, fo), jnp.float32) * 0.1

    return {
        "w1": w(ks[0], in_features, hidden_features),
        "b1": jax.random.normal(ks[1], (hidden_features,), jnp.float32) * 0.05,
        "w2": w(ks[2], hidden_features, out_features),
        "b2": jax.random.normal(ks[3], (out_features,), jnp.float32) * 0.05,
        "wW": w(ks[4], in_features, out_features),         # orthogonal in torch; synthetic here
        "bW": jnp.zeros((out_features,), jnp.float32),     # init_fn sets W bias to 0
        "wc1": w(ks[5], action_features, 2 * hidden_features),
        "bc1": jax.random.normal(ks[6], (2 * hidden_features,), jnp.float32) * 0.05,
        "wc2": w(ks[7], action_features, 2 * out_features),
        "bc2": jax.random.normal(ks[8], (2 * out_features,), jnp.float32) * 0.05,
    }


def reference_forward(x, action, params):
    """Pure-JAX reference of the PyTorch forward under the kernel's numeric
    contract: bf16 matmul operands, f32 accumulation, f32 LayerNorm/FiLM."""
    H = params["b1"].shape[-1]
    OUT = params["bW"].shape[-1]
    A = params["wc1"].shape[0]

    def bf16_dot(a, wm):
        return jnp.dot(a.astype(jnp.bfloat16), wm.astype(jnp.bfloat16),
                       preferred_element_type=jnp.float32)

    onehot = jax.nn.one_hot(action, A, dtype=jnp.float32)

    def film(hin, wc, bc, dim):
        cond = onehot @ wc + bc
        gamma, beta = cond[:, :dim], cond[:, dim:]
        mu = jnp.mean(hin, axis=-1, keepdims=True)
        c = hin - mu
        var = jnp.mean(c * c, axis=-1, keepdims=True)
        return c * jax.lax.rsqrt(var + LN_EPS) * gamma + beta

    residual = bf16_dot(x, params["wW"]) + params["bW"]
    h = bf16_dot(x, params["w1"]) + params["b1"]
    h = jnp.maximum(film(h, params["wc1"], params["bc1"], H), 0.0)
    y = bf16_dot(h, params["w2"]) + params["b2"]
    y = film(y, params["wc2"], params["bc2"], OUT)
    return y + residual


if __name__ == "__main__":
    in_features = 32
    hidden_features = 48
    out_features = 24
    action_features = 4
    batch = 5

    key = jax.random.PRNGKey(0)
    kx, ka, kp = jax.random.split(key, 3)
    x = jax.random.normal(kx, (batch, in_features), jnp.float32)
    action = jax.random.randint(ka, (batch,), 0, action_features, jnp.int32)
    params = make_params(kp, in_features, hidden_features, out_features, action_features)

    out = resblock_fc_film(x, action, params)
    out = jax.block_until_ready(out)

    ref = reference_forward(x, action, params)
    assert out.shape == (batch, out_features)
    assert bool(jnp.all(jnp.isfinite(out)))
    assert jnp.allclose(out, ref, atol=2e-3, rtol=2e-3), "mismatch vs reference"

    print("KERNEL_OK")
</pallas_src>

<mosaic_0001>
module attributes {stable_mosaic.version = 11 : i64} {
  func.func @_resblock_kernel(%arg0: i32, %arg1: memref<8x128xf32, #tpu.memory_space<vmem>>, %arg2: memref<8x1xi32, #tpu.memory_space<vmem>>, %arg3: memref<128x256xbf16, #tpu.memory_space<vmem>>, %arg4: memref<1x256xf32, #tpu.memory_space<vmem>>, %arg5: memref<8x512xf32, #tpu.memory_space<vmem>>, %arg6: memref<1x512xf32, #tpu.memory_space<vmem>>, %arg7: memref<128x128xbf16, #tpu.memory_space<vmem>>, %arg8: memref<1x128xf32, #tpu.memory_space<vmem>>, %arg9: memref<8x128xf32, #tpu.memory_space<vmem>>) attributes {dimension_semantics = [#tpu.dimension_semantics<parallel>], iteration_bounds = array<i64: 1>, scalar_prefetch = 0 : i64, scratch_operands = 0 : i64, tpu.core_type = #tpu.core_type<tc>, window_params = [{transform_indices = @transform_0, window_bounds = array<i64: 8, 128>}, {transform_indices = @transform_1, window_bounds = array<i64: 8, 1>}, {pipeline_mode = #tpu.pipeline_mode<synchronous>, transform_indices = @transform_2, window_bounds = array<i64: 128, 256>}, {pipeline_mode = #tpu.pipeline_mode<synchronous>, transform_indices = @transform_3, window_bounds = array<i64: 1, 256>}, {pipeline_mode = #tpu.pipeline_mode<synchronous>, transform_indices = @transform_4, window_bounds = array<i64: 8, 512>}, {pipeline_mode = #tpu.pipeline_mode<synchronous>, transform_indices = @transform_5, window_bounds = array<i64: 1, 512>}, {pipeline_mode = #tpu.pipeline_mode<synchronous>, transform_indices = @transform_6, window_bounds = array<i64: 128, 128>}, {pipeline_mode = #tpu.pipeline_mode<synchronous>, transform_indices = @transform_7, window_bounds = array<i64: 1, 128>}, {transform_indices = @transform_8, window_bounds = array<i64: 8, 128>}]} {
    %c0 = arith.constant 0 : index
    %c0_0 = arith.constant 0 : index
    %0 = vector.load %arg1[%c0, %c0_0] : memref<8x128xf32, #tpu.memory_space<vmem>>, vector<8x128xf32>
    %1 = arith.truncf %0 : vector<8x128xf32> to vector<8x128xbf16>
    %c0_1 = arith.constant 0 : index
    %c0_2 = arith.constant 0 : index
    %2 = vector.load %arg2[%c0_1, %c0_2] : memref<8x1xi32, #tpu.memory_space<vmem>>, vector<8x1xi32>
    %c0_3 = arith.constant 0 : index
    %c0_4 = arith.constant 0 : index
    %3 = vector.load %arg3[%c0_3, %c0_4] : memref<128x256xbf16, #tpu.memory_space<vmem>>, vector<128x256xbf16>
    %cst = arith.constant dense<0.000000e+00> : vector<8x256xf32>
    %4 = tpu.matmul %1, %3, %cst {dimension_numbers = #tpu.dot_dimension_numbers<[1], [0], [0], [1], [0, 0, 1, 1], [], []>} : vector<8x128xbf16>, vector<128x256xbf16>, vector<8x256xf32> -> vector<8x256xf32>
    %c0_5 = arith.constant 0 : index
    %c0_6 = arith.constant 0 : index
    %5 = vector.load %arg4[%c0_5, %c0_6] : memref<1x256xf32, #tpu.memory_space<vmem>>, vector<1x256xf32>
    %6 = vector.broadcast %5 : vector<1x256xf32> to vector<8x256xf32>
    %7 = arith.addf %4, %6 : vector<8x256xf32>
    %8 = vector.extract_strided_slice %7 {offsets = [0, 128], sizes = [8, 128], strides = [1, 1]} : vector<8x256xf32> to vector<8x128xf32>
    %c0_7 = arith.constant 0 : index
    %c0_8 = arith.constant 0 : index
    %9 = vector.load %arg9[%c0_7, %c0_8] : memref<8x128xf32, #tpu.memory_space<vmem>>, vector<8x128xf32>
    tpu.vector_store %arg9[%c0_7, %c0_8], %8 {strides = array<i32>} : memref<8x128xf32, #tpu.memory_space<vmem>>, vector<8x128xf32>,
    %10 = vector.extract_strided_slice %7 {offsets = [0, 0], sizes = [8, 128], strides = [1, 1]} : vector<8x256xf32> to vector<8x128xf32>
    %11 = tpu.iota {dimensions = array<i32: 1>} : vector<8x8xi32>
    %12 = vector.broadcast %2 : vector<8x1xi32> to vector<8x8xi32>
    %13 = arith.cmpi eq, %11, %12 : vector<8x8xi32>
    %14 = arith.extui %13 : vector<8x8xi1> to vector<8x8xi32>
    %15 = arith.sitofp %14 : vector<8x8xi32> to vector<8x8xf32>
    %c0_9 = arith.constant 0 : index
    %c0_10 = arith.constant 0 : index
    %16 = vector.load %arg5[%c0_9, %c0_10] : memref<8x512xf32, #tpu.memory_space<vmem>>, vector<8x512xf32>
    %cst_11 = arith.constant dense<0.000000e+00> : vector<8x512xf32>
    %17 = tpu.matmul %15, %16, %cst_11 {dimension_numbers = #tpu.dot_dimension_numbers<[1], [0], [0], [1], [0, 0, 1, 1], [], []>} : vector<8x8xf32>, vector<8x512xf32>, vector<8x512xf32> -> vector<8x512xf32>
    %c0_12 = arith.constant 0 : index
    %c0_13 = arith.constant 0 : index
    %18 = vector.load %arg6[%c0_12, %c0_13] : memref<1x512xf32, #tpu.memory_space<vmem>>, vector<1x512xf32>
    %19 = vector.broadcast %18 : vector<1x512xf32> to vector<8x512xf32>
    %20 = arith.addf %17, %19 : vector<8x512xf32>
    %21 = vector.extract_strided_slice %20 {offsets = [0, 0], sizes = [8, 128], strides = [1, 1]} : vector<8x512xf32> to vector<8x128xf32>
    %22 = vector.extract_strided_slice %20 {offsets = [0, 128], sizes = [8, 128], strides = [1, 1]} : vector<8x512xf32> to vector<8x128xf32>
    %23 = vector.extract_strided_slice %20 {offsets = [0, 256], sizes = [8, 128], strides = [1, 1]} : vector<8x512xf32> to vector<8x128xf32>
    %24 = vector.extract_strided_slice %20 {offsets = [0, 384], sizes = [8, 128], strides = [1, 1]} : vector<8x512xf32> to vector<8x128xf32>
    %cst_14 = arith.constant dense<0.000000e+00> : vector<8xf32>
    %25 = vector.multi_reduction <add>, %10, %cst_14 [1] : vector<8x128xf32> to vector<8xf32>
    %26 = vector.shape_cast %25 : vector<8xf32> to vector<8x1xf32>
    %cst_15 = arith.constant 0.020833334 : f32
    %27 = vector.broadcast %cst_15 : f32 to vector<8x1xf32>
    %28 = arith.mulf %26, %27 : vector<8x1xf32>
    %29 = vector.broadcast %28 : vector<8x1xf32> to vector<8x128xf32>
    %30 = arith.subf %10, %29 : vector<8x128xf32>
    %31 = tpu.iota {dimensions = array<i32: 1>} : vector<8x128xi32>
    %c48_i32 = arith.constant 48 : i32
    %32 = vector.broadcast %c48_i32 : i32 to vector<8x128xi32>
    %33 = arith.cmpi slt, %31, %32 : vector<8x128xi32>
    %cst_16 = arith.constant 0.000000e+00 : f32
    %34 = vector.broadcast %cst_16 : f32 to vector<8x128xf32>
    %35 = arith.select %33, %30, %34 : vector<8x128xi1>, vector<8x128xf32>
    %36 = arith.mulf %35, %35 : vector<8x128xf32>
    %cst_17 = arith.constant dense<0.000000e+00> : vector<8xf32>
    %37 = vector.multi_reduction <add>, %36, %cst_17 [1] : vector<8x128xf32> to vector<8xf32>
    %38 = vector.shape_cast %37 : vector<8xf32> to vector<8x1xf32>
    %cst_18 = arith.constant 0.020833334 : f32
    %39 = vector.broadcast %cst_18 : f32 to vector<8x1xf32>
    %40 = arith.mulf %38, %39 : vector<8x1xf32>
    %cst_19 = arith.constant 9.99999974E-6 : f32
    %41 = vector.broadcast %cst_19 : f32 to vector<8x1xf32>
    %42 = arith.addf %40, %41 : vector<8x1xf32>
    %43 = math.rsqrt %42 : vector<8x1xf32>
    %44 = vector.broadcast %43 : vector<8x1xf32> to vector<8x128xf32>
    %45 = arith.mulf %35, %44 : vector<8x128xf32>
    %46 = arith.mulf %45, %21 : vector<8x128xf32>
    %47 = arith.addf %46, %22 : vector<8x128xf32>
    %cst_20 = arith.constant 0.000000e+00 : f32
    %48 = vector.broadcast %cst_20 : f32 to vector<8x128xf32>
    %49 = arith.maximumf %47, %48 : vector<8x128xf32>
    %50 = arith.truncf %49 : vector<8x128xf32> to vector<8x128xbf16>
    %c0_21 = arith.constant 0 : index
    %c0_22 = arith.constant 0 : index
    %51 = vector.load %arg7[%c0_21, %c0_22] : memref<128x128xbf16, #tpu.memory_space<vmem>>, vector<128x128xbf16>
    %cst_23 = arith.constant dense<0.000000e+00> : vector<8x128xf32>
    %52 = tpu.matmul %50, %51, %cst_23 {dimension_numbers = #tpu.dot_dimension_numbers<[1], [0], [0], [1], [0, 0, 1, 1], [], []>} : vector<8x128xbf16>, vector<128x128xbf16>, vector<8x128xf32> -> vector<8x128xf32>
    %c0_24 = arith.constant 0 : index
    %c0_25 = arith.constant 0 : index
    %53 = vector.load %arg8[%c0_24, %c0_25] : memref<1x128xf32, #tpu.memory_space<vmem>>, vector<1x128xf32>
    %54 = vector.broadcast %53 : vector<1x128xf32> to vector<8x128xf32>
    %55 = arith.addf %52, %54 : vector<8x128xf32>
    %cst_26 = arith.constant dense<0.000000e+00> : vector<8xf32>
    %56 = vector.multi_reduction <add>, %55, %cst_26 [1] : vector<8x128xf32> to vector<8xf32>
    %57 = vector.shape_cast %56 : vector<8xf32> to vector<8x1xf32>
    %cst_27 = arith.constant 0.0416666679 : f32
    %58 = vector.broadcast %cst_27 : f32 to vector<8x1xf32>
    %59 = arith.mulf %57, %58 : vector<8x1xf32>
    %60 = vector.broadcast %59 : vector<8x1xf32> to vector<8x128xf32>
    %61 = arith.subf %55, %60 : vector<8x128xf32>
    %62 = tpu.iota {dimensions = array<i32: 1>} : vector<8x128xi32>
    %c24_i32 = arith.constant 24 : i32
    %63 = vector.broadcast %c24_i32 : i32 to vector<8x128xi32>
    %64 = arith.cmpi slt, %62, %63 : vector<8x128xi32>
    %cst_28 = arith.constant 0.000000e+00 : f32
    %65 = vector.broadcast %cst_28 : f32 to vector<8x128xf32>
    %66 = arith.select %64, %61, %65 : vector<8x128xi1>, vector<8x128xf32>
    %67 = arith.mulf %66, %66 : vector<8x128xf32>
    %cst_29 = arith.constant dense<0.000000e+00> : vector<8xf32>
    %68 = vector.multi_reduction <add>, %67, %cst_29 [1] : vector<8x128xf32> to vector<8xf32>
    %69 = vector.shape_cast %68 : vector<8xf32> to vector<8x1xf32>
    %cst_30 = arith.constant 0.0416666679 : f32
    %70 = vector.broadcast %cst_30 : f32 to vector<8x1xf32>
    %71 = arith.mulf %69, %70 : vector<8x1xf32>
    %cst_31 = arith.constant 9.99999974E-6 : f32
    %72 = vector.broadcast %cst_31 : f32 to vector<8x1xf32>
    %73 = arith.addf %71, %72 : vector<8x1xf32>
    %74 = math.rsqrt %73 : vector<8x1xf32>
    %75 = vector.broadcast %74 : vector<8x1xf32> to vector<8x128xf32>
    %76 = arith.mulf %66, %75 : vector<8x128xf32>
    %77 = arith.mulf %76, %23 : vector<8x128xf32>
    %78 = arith.addf %77, %24 : vector<8x128xf32>
    %c0_32 = arith.constant 0 : index
    %c0_33 = arith.constant 0 : index
    %79 = vector.load %arg9[%c0_32, %c0_33] : memref<8x128xf32, #tpu.memory_space<vmem>>, vector<8x128xf32>
    %80 = arith.addf %79, %78 : vector<8x128xf32>
    %c0_34 = arith.constant 0 : index
    %c0_35 = arith.constant 0 : index
    %81 = vector.load %arg9[%c0_34, %c0_35] : memref<8x128xf32, #tpu.memory_space<vmem>>, vector<8x128xf32>
    tpu.vector_store %arg9[%c0_34, %c0_35], %80 {strides = array<i32>} : memref<8x128xf32, #tpu.memory_space<vmem>>, vector<8x128xf32>,
    return
  }
  func.func @transform_0(%arg0: i32) -> (i32, i32) {
    %c0_i32 = arith.constant 0 : i32
    %c0_i32_0 = arith.constant 0 : i32
    return %arg0, %c0_i32 : i32, i32
  }
  func.func @transform_1(%arg0: i32) -> (i32, i32) {
    %c0_i32 = arith.constant 0 : i32
    %c0_i32_0 = arith.constant 0 : i32
    return %arg0, %c0_i32 : i32, i32
  }
  func.func @transform_2(%arg0: i32) -> (i32, i32) {
    %c0_i32 = arith.constant 0 : i32
    %c0_i32_0 = arith.constant 0 : i32
    %c0_i32_1 = arith.constant 0 : i32
    return %c0_i32, %c0_i32_0 : i32, i32
  }
  func.func @transform_3(%arg0: i32) -> (i32, i32) {
    %c0_i32 = arith.constant 0 : i32
    %c0_i32_0 = arith.constant 0 : i32
    %c0_i32_1 = arith.constant 0 : i32
    return %c0_i32, %c0_i32_0 : i32, i32
  }
  func.func @transform_4(%arg0: i32) -> (i32, i32) {
    %c0_i32 = arith.constant 0 : i32
    %c0_i32_0 = arith.constant 0 : i32
    %c0_i32_1 = arith.constant 0 : i32
    return %c0_i32, %c0_i32_0 : i32, i32
  }
  func.func @transform_5(%arg0: i32) -> (i32, i32) {
    %c0_i32 = arith.constant 0 : i32
    %c0_i32_0 = arith.constant 0 : i32
    %c0_i32_1 = arith.constant 0 : i32
    return %c0_i32, %c0_i32_0 : i32, i32
  }
  func.func @transform_6(%arg0: i32) -> (i32, i32) {
    %c0_i32 = arith.constant 0 : i32
    %c0_i32_0 = arith.constant 0 : i32
    %c0_i32_1 = arith.constant 0 : i32
    return %c0_i32, %c0_i32_0 : i32, i32
  }
  func.func @transform_7(%arg0: i32) -> (i32, i32) {
    %c0_i32 = arith.constant 0 : i32
    %c0_i32_0 = arith.constant 0 : i32
    %c0_i32_1 = arith.constant 0 : i32
    return %c0_i32, %c0_i32_0 : i32, i32
  }
  func.func @transform_8(%arg0: i32) -> (i32, i32) {
    %c0_i32 = arith.constant 0 : i32
    %c0_i32_0 = arith.constant 0 : i32
    return %arg0, %c0_i32 : i32, i32
  }
}

module attributes {stable_mosaic.version = 11 : i64} {
  func.func @_resblock_kernel(%arg0: i32, %arg1: memref<8x128xf32, #tpu.memory_space<vmem>>, %arg2: memref<8x1xi32, #tpu.memory_space<vmem>>, %arg3: memref<128x256xbf16, #tpu.memory_space<vmem>>, %arg4: memref<1x256xf32, #tpu.memory_space<vmem>>, %arg5: memref<8x512xf32, #tpu.memory_space<vmem>>, %arg6: memref<1x512xf32, #tpu.memory_space<vmem>>, %arg7: memref<128x128xbf16, #tpu.memory_space<vmem>>, %arg8: memref<1x128xf32, #tpu.memory_space<vmem>>, %arg9: memref<8x128xf32, #tpu.memory_space<vmem>>) attributes {dimension_semantics = [#tpu.dimension_semantics<parallel>], iteration_bounds = array<i64: 1>, scalar_prefetch = 0 : i64, scratch_operands = 0 : i64, tpu.core_type = #tpu.core_type<tc>, window_params = [{transform_indices = @transform_0, window_bounds = array<i64: 8, 128>}, {transform_indices = @transform_1, window_bounds = array<i64: 8, 1>}, {pipeline_mode = #tpu.pipeline_mode<synchronous>, transform_indices = @transform_2, window_bounds = array<i64: 128, 256>}, {pipeline_mode = #tpu.pipeline_mode<synchronous>, transform_indices = @transform_3, window_bounds = array<i64: 1, 256>}, {pipeline_mode = #tpu.pipeline_mode<synchronous>, transform_indices = @transform_4, window_bounds = array<i64: 8, 512>}, {pipeline_mode = #tpu.pipeline_mode<synchronous>, transform_indices = @transform_5, window_bounds = array<i64: 1, 512>}, {pipeline_mode = #tpu.pipeline_mode<synchronous>, transform_indices = @transform_6, window_bounds = array<i64: 128, 128>}, {pipeline_mode = #tpu.pipeline_mode<synchronous>, transform_indices = @transform_7, window_bounds = array<i64: 1, 128>}, {transform_indices = @transform_8, window_bounds = array<i64: 8, 128>}]} {
    %c0 = arith.constant 0 : index
    %c0_0 = arith.constant 0 : index
    %0 = vector.load %arg1[%c0, %c0_0] : memref<8x128xf32, #tpu.memory_space<vmem>>, vector<8x128xf32>
    %1 = arith.truncf %0 : vector<8x128xf32> to vector<8x128xbf16>
    %c0_1 = arith.constant 0 : index
    %c0_2 = arith.constant 0 : index
    %2 = vector.load %arg2[%c0_1, %c0_2] : memref<8x1xi32, #tpu.memory_space<vmem>>, vector<8x1xi32>
    %c0_3 = arith.constant 0 : index
    %c0_4 = arith.constant 0 : index
    %3 = vector.load %arg3[%c0_3, %c0_4] : memref<128x256xbf16, #tpu.memory_space<vmem>>, vector<128x256xbf16>
    %cst = arith.constant dense<0.000000e+00> : vector<8x256xf32>
    %4 = tpu.matmul %1, %3, %cst {dimension_numbers = #tpu.dot_dimension_numbers<[1], [0], [0], [1], [0, 0, 1, 1], [], []>} : vector<8x128xbf16>, vector<128x256xbf16>, vector<8x256xf32> -> vector<8x256xf32>
    %c0_5 = arith.constant 0 : index
    %c0_6 = arith.constant 0 : index
    %5 = vector.load %arg4[%c0_5, %c0_6] : memref<1x256xf32, #tpu.memory_space<vmem>>, vector<1x256xf32>
    %6 = vector.broadcast %5 : vector<1x256xf32> to vector<8x256xf32>
    %7 = arith.addf %4, %6 : vector<8x256xf32>
    %8 = vector.extract_strided_slice %7 {offsets = [0, 128], sizes = [8, 128], strides = [1, 1]} : vector<8x256xf32> to vector<8x128xf32>
    %c0_7 = arith.constant 0 : index
    %c0_8 = arith.constant 0 : index
    %9 = vector.load %arg9[%c0_7, %c0_8] : memref<8x128xf32, #tpu.memory_space<vmem>>, vector<8x128xf32>
    tpu.vector_store %arg9[%c0_7, %c0_8], %8 {strides = array<i32>} : memref<8x128xf32, #tpu.memory_space<vmem>>, vector<8x128xf32>,
    %10 = vector.extract_strided_slice %7 {offsets = [0, 0], sizes = [8, 128], strides = [1, 1]} : vector<8x256xf32> to vector<8x128xf32>
    %11 = tpu.iota {dimensions = array<i32: 1>} : vector<8x8xi32>
    %12 = vector.broadcast %2 : vector<8x1xi32> to vector<8x8xi32>
    %13 = arith.cmpi eq, %11, %12 : vector<8x8xi32>
    %14 = arith.extui %13 : vector<8x8xi1> to vector<8x8xi32>
    %15 = arith.sitofp %14 : vector<8x8xi32> to vector<8x8xf32>
    %c0_9 = arith.constant 0 : index
    %c0_10 = arith.constant 0 : index
    %16 = vector.load %arg5[%c0_9, %c0_10] : memref<8x512xf32, #tpu.memory_space<vmem>>, vector<8x512xf32>
    %cst_11 = arith.constant dense<0.000000e+00> : vector<8x512xf32>
    %17 = tpu.matmul %15, %16, %cst_11 {dimension_numbers = #tpu.dot_dimension_numbers<[1], [0], [0], [1], [0, 0, 1, 1], [], []>} : vector<8x8xf32>, vector<8x512xf32>, vector<8x512xf32> -> vector<8x512xf32>
    %c0_12 = arith.constant 0 : index
    %c0_13 = arith.constant 0 : index
    %18 = vector.load %arg6[%c0_12, %c0_13] : memref<1x512xf32, #tpu.memory_space<vmem>>, vector<1x512xf32>
    %19 = vector.broadcast %18 : vector<1x512xf32> to vector<8x512xf32>
    %20 = arith.addf %17, %19 : vector<8x512xf32>
    %21 = vector.extract_strided_slice %20 {offsets = [0, 0], sizes = [8, 128], strides = [1, 1]} : vector<8x512xf32> to vector<8x128xf32>
    %22 = vector.extract_strided_slice %20 {offsets = [0, 128], sizes = [8, 128], strides = [1, 1]} : vector<8x512xf32> to vector<8x128xf32>
    %23 = vector.extract_strided_slice %20 {offsets = [0, 256], sizes = [8, 128], strides = [1, 1]} : vector<8x512xf32> to vector<8x128xf32>
    %24 = vector.extract_strided_slice %20 {offsets = [0, 384], sizes = [8, 128], strides = [1, 1]} : vector<8x512xf32> to vector<8x128xf32>
    %cst_14 = arith.constant dense<0.000000e+00> : vector<8xf32>
    %25 = vector.multi_reduction <add>, %10, %cst_14 [1] : vector<8x128xf32> to vector<8xf32>
    %26 = vector.shape_cast %25 : vector<8xf32> to vector<8x1xf32>
    %cst_15 = arith.constant 0.020833334 : f32
    %27 = vector.broadcast %cst_15 : f32 to vector<8x1xf32>
    %28 = arith.mulf %26, %27 : vector<8x1xf32>
    %29 = vector.broadcast %28 : vector<8x1xf32> to vector<8x128xf32>
    %30 = arith.subf %10, %29 : vector<8x128xf32>
    %31 = tpu.iota {dimensions = array<i32: 1>} : vector<8x128xi32>
    %c48_i32 = arith.constant 48 : i32
    %32 = vector.broadcast %c48_i32 : i32 to vector<8x128xi32>
    %33 = arith.cmpi slt, %31, %32 : vector<8x128xi32>
    %cst_16 = arith.constant 0.000000e+00 : f32
    %34 = vector.broadcast %cst_16 : f32 to vector<8x128xf32>
    %35 = arith.select %33, %30, %34 : vector<8x128xi1>, vector<8x128xf32>
    %36 = arith.mulf %35, %35 : vector<8x128xf32>
    %cst_17 = arith.constant dense<0.000000e+00> : vector<8xf32>
    %37 = vector.multi_reduction <add>, %36, %cst_17 [1] : vector<8x128xf32> to vector<8xf32>
    %38 = vector.shape_cast %37 : vector<8xf32> to vector<8x1xf32>
    %cst_18 = arith.constant 0.020833334 : f32
    %39 = vector.broadcast %cst_18 : f32 to vector<8x1xf32>
    %40 = arith.mulf %38, %39 : vector<8x1xf32>
    %cst_19 = arith.constant 9.99999974E-6 : f32
    %41 = vector.broadcast %cst_19 : f32 to vector<8x1xf32>
    %42 = arith.addf %40, %41 : vector<8x1xf32>
    %43 = math.rsqrt %42 : vector<8x1xf32>
    %44 = vector.broadcast %43 : vector<8x1xf32> to vector<8x128xf32>
    %45 = arith.mulf %35, %44 : vector<8x128xf32>
    %46 = arith.mulf %45, %21 : vector<8x128xf32>
    %47 = arith.addf %46, %22 : vector<8x128xf32>
    %cst_20 = arith.constant 0.000000e+00 : f32
    %48 = vector.broadcast %cst_20 : f32 to vector<8x128xf32>
    %49 = arith.maximumf %47, %48 : vector<8x128xf32>
    %50 = arith.truncf %49 : vector<8x128xf32> to vector<8x128xbf16>
    %c0_21 = arith.constant 0 : index
    %c0_22 = arith.constant 0 : index
    %51 = vector.load %arg7[%c0_21, %c0_22] : memref<128x128xbf16, #tpu.memory_space<vmem>>, vector<128x128xbf16>
    %cst_23 = arith.constant dense<0.000000e+00> : vector<8x128xf32>
    %52 = tpu.matmul %50, %51, %cst_23 {dimension_numbers = #tpu.dot_dimension_numbers<[1], [0], [0], [1], [0, 0, 1, 1], [], []>} : vector<8x128xbf16>, vector<128x128xbf16>, vector<8x128xf32> -> vector<8x128xf32>
    %c0_24 = arith.constant 0 : index
    %c0_25 = arith.constant 0 : index
    %53 = vector.load %arg8[%c0_24, %c0_25] : memref<1x128xf32, #tpu.memory_space<vmem>>, vector<1x128xf32>
    %54 = vector.broadcast %53 : vector<1x128xf32> to vector<8x128xf32>
    %55 = arith.addf %52, %54 : vector<8x128xf32>
    %cst_26 = arith.constant dense<0.000000e+00> : vector<8xf32>
    %56 = vector.multi_reduction <add>, %55, %cst_26 [1] : vector<8x128xf32> to vector<8xf32>
    %57 = vector.shape_cast %56 : vector<8xf32> to vector<8x1xf32>
    %cst_27 = arith.constant 0.0416666679 : f32
    %58 = vector.broadcast %cst_27 : f32 to vector<8x1xf32>
    %59 = arith.mulf %57, %58 : vector<8x1xf32>
    %60 = vector.broadcast %59 : vector<8x1xf32> to vector<8x128xf32>
    %61 = arith.subf %55, %60 : vector<8x128xf32>
    %62 = tpu.iota {dimensions = array<i32: 1>} : vector<8x128xi32>
    %c24_i32 = arith.constant 24 : i32
    %63 = vector.broadcast %c24_i32 : i32 to vector<8x128xi32>
    %64 = arith.cmpi slt, %62, %63 : vector<8x128xi32>
    %cst_28 = arith.constant 0.000000e+00 : f32
    %65 = vector.broadcast %cst_28 : f32 to vector<8x128xf32>
    %66 = arith.select %64, %61, %65 : vector<8x128xi1>, vector<8x128xf32>
    %67 = arith.mulf %66, %66 : vector<8x128xf32>
    %cst_29 = arith.constant dense<0.000000e+00> : vector<8xf32>
    %68 = vector.multi_reduction <add>, %67, %cst_29 [1] : vector<8x128xf32> to vector<8xf32>
    %69 = vector.shape_cast %68 : vector<8xf32> to vector<8x1xf32>
    %cst_30 = arith.constant 0.0416666679 : f32
    %70 = vector.broadcast %cst_30 : f32 to vector<8x1xf32>
    %71 = arith.mulf %69, %70 : vector<8x1xf32>
    %cst_31 = arith.constant 9.99999974E-6 : f32
    %72 = vector.broadcast %cst_31 : f32 to vector<8x1xf32>
    %73 = arith.addf %71, %72 : vector<8x1xf32>
    %74 = math.rsqrt %73 : vector<8x1xf32>
    %75 = vector.broadcast %74 : vector<8x1xf32> to vector<8x128xf32>
    %76 = arith.mulf %66, %75 : vector<8x128xf32>
    %77 = arith.mulf %76, %23 : vector<8x128xf32>
    %78 = arith.addf %77, %24 : vector<8x128xf32>
    %c0_32 = arith.constant 0 : index
    %c0_33 = arith.constant 0 : index
    %79 = vector.load %arg9[%c0_32, %c0_33] : memref<8x128xf32, #tpu.memory_space<vmem>>, vector<8x128xf32>
    %80 = arith.addf %79, %78 : vector<8x128xf32>
    %c0_34 = arith.constant 0 : index
    %c0_35 = arith.constant 0 : index
    %81 = vector.load %arg9[%c0_34, %c0_35] : memref<8x128xf32, #tpu.memory_space<vmem>>, vector<8x128xf32>
    tpu.vector_store %arg9[%c0_34, %c0_35], %80 {strides = array<i32>} : memref<8x128xf32, #tpu.memory_space<vmem>>, vector<8x128xf32>,
    return
  }
  func.func @transform_0(%arg0: i32) -> (i32, i32) {
    %c0_i32 = arith.constant 0 : i32
    %c0_i32_0 = arith.constant 0 : i32
    return %arg0, %c0_i32 : i32, i32
  }
  func.func @transform_1(%arg0: i32) -> (i32, i32) {
    %c0_i32 = arith.constant 0 : i32
    %c0_i32_0 = arith.constant 0 : i32
    return %arg0, %c0_i32 : i32, i32
  }
  func.func @transform_2(%arg0: i32) -> (i32, i32) {
    %c0_i32 = arith.constant 0 : i32
    %c0_i32_0 = arith.constant 0 : i32
    %c0_i32_1 = arith.constant 0 : i32
    return %c0_i32, %c0_i32_0 : i32, i32
  }
  func.func @transform_3(%arg0: i32) -> (i32, i32) {
    %c0_i32 = arith.constant 0 : i32
    %c0_i32_0 = arith.constant 0 : i32
    %c0_i32_1 = arith.constant 0 : i32
    return %c0_i32, %c0_i32_0 : i32, i32
  }
  func.func @transform_4(%arg0: i32) -> (i32, i32) {
    %c0_i32 = arith.constant 0 : i32
    %c0_i32_0 = arith.constant 0 : i32
    %c0_i32_1 = arith.constant 0 : i32
    return %c0_i32, %c0_i32_0 : i32, i32
  }
  func.func @transform_5(%arg0: i32) -> (i32, i32) {
    %c0_i32 = arith.constant 0 : i32
    %c0_i32_0 = arith.constant 0 : i32
    %c0_i32_1 = arith.constant 0 : i32
    return %c0_i32, %c0_i32_0 : i32, i32
  }
  func.func @transform_6(%arg0: i32) -> (i32, i32) {
    %c0_i32 = arith.constant 0 : i32
    %c0_i32_0 = arith.constant 0 : i32
    %c0_i32_1 = arith.constant 0 : i32
    return %c0_i32, %c0_i32_0 : i32, i32
  }
  func.func @transform_7(%arg0: i32) -> (i32, i32) {
    %c0_i32 = arith.constant 0 : i32
    %c0_i32_0 = arith.constant 0 : i32
    %c0_i32_1 = arith.constant 0 : i32
    return %c0_i32, %c0_i32_0 : i32, i32
  }
  func.func @transform_8(%arg0: i32) -> (i32, i32) {
    %c0_i32 = arith.constant 0 : i32
    %c0_i32_0 = arith.constant 0 : i32
    return %arg0, %c0_i32 : i32, i32
  }
}

</mosaic_0001>

<bundles_post_ra>
// kernel: tpu_custom_call.1
= control target key start
LH: loop header
LB: loop body
LE: loop exit
PB: predicated region body
PF: predicated region fallthrough
CT: control target
= control target key end

     0   :  { %13 = vsyncpa [#allocation3], 0  ;;  %s920_s0 = inlined_call_operand.vmem [shape: f32[8,128], index: 0, kind: input, shape index: {}]   ;;  %s921_s1 = inlined_call_operand.vmem [shape: s32[8,1], index: 1, kind: input, shape index: {}]   ;;  %s922_s2 = inlined_call_operand.hbm [shape: bf16[128,256], index: 2, kind: input, shape index: {}]   ;;  %s923_s3 = inlined_call_operand.vmem [shape: f32[1,256], index: 3, kind: input, shape index: {}]   ;;  %s924_s4 = inlined_call_operand.hbm [shape: f32[8,512], index: 4, kind: input, shape index: {}]   ;;  %s925_s5 = inlined_call_operand.vmem [shape: f32[1,512], index: 5, kind: input, shape index: {}]   ;;  %s926_s6 = inlined_call_operand.hbm [shape: bf16[128,128], index: 6, kind: input, shape index: {}]   ;;  %s927_s7 = inlined_call_operand.vmem [shape: f32[1,128], index: 7, kind: input, shape index: {}]   ;;  %s928_s8 = inlined_call_operand.hbm [shape: f32[8,128], index: 8, kind: output, shape index: {}]  }
   0x1   :  { %14 = vsyncpa [#allocation6], 0 }
   0x2   :  { %15 = vsyncpa [#allocation4], 0  ;;  %s764_s27 = smov [#allocation5]   ;;  %s765_s29 = smov [#allocation2]  }
   0x3   :  { %s40_s28 = sshll.u32 %s764_s27, 4  ;;  %s25_s30 = sshll.u32 %s765_s29, 4  ;;  %s41_s28 = int_to_ptr.vmem [resolvable:$true] %s40_s28  ;;  %s820_s30 = int_to_ptr.vmem [resolvable:$true] %s25_s30 }
   0x4   :  { %s670_s11 = scalar_lea.hbm %s924_s4, 512 }
   0x5   :  { %p671_p0 = scmp.ne.s32.totalorder %s924_s4, %s670_s11  ;;  %p674_p1 = scmp.lt.u32.totalorder %s670_s11, %s924_s4 }
   0x7   :  { %p676_p2 = pnand %p674_p1, %p671_p0 }
   0x9   :  { %679 = shalt.err (!%p676_p2)
}
   0xa   :  { %s680_s16 = scalar_lea.vmem %s41_s28, 512  ;;  %p685_p4 = scmp.lt.s32.totalorder %s41_s28, %s41_s28 }
   0xb   :  { %p681_p3 = scmp.ne.s32.totalorder %s41_s28, %s680_s16  ;;  %p686_p5 = scmp.lt.s32.totalorder %s680_s16, %s680_s16 }
   0xd   :  { %p687_p6 = por %p686_p5, %p685_p4 }
   0xf   :  { %p688_p7 = pnand %p687_p6, %p681_p3 }
  0x11   :  { %691 = shalt.err (!%p688_p7)
}
  0x12   :  { %43 = dma.hbm_to_vmem [thread:$0]  %s924_s4, 512, %s41_s28, [#allocation6]  }
  0x13   :  { %s692_s21 = scalar_lea.hbm %s922_s2, 2048 }
  0x14   :  { %p693_p8 = scmp.ne.s32.totalorder %s922_s2, %s692_s21  ;;  %p696_p9 = scmp.lt.u32.totalorder %s692_s21, %s922_s2 }
  0x16   :  { %p698_p10 = pnand %p696_p9, %p693_p8 }
  0x18   :  { %701 = shalt.err (!%p698_p10)
}
  0x19   :  { %s702_s26 = scalar_lea.vmem %s820_s30, 2048  ;;  %p707_p12 = scmp.lt.s32.totalorder %s820_s30, %s820_s30 }
  0x1a   :  { %p703_p11 = scmp.ne.s32.totalorder %s820_s30, %s702_s26  ;;  %p708_p13 = scmp.lt.s32.totalorder %s702_s26, %s702_s26 }
  0x1c   :  { %p709_p0 = por %p708_p13, %p707_p12 }
  0x1e   :  { %p710_p1 = pnand %p709_p0, %p703_p11 }
  0x20   :  { %713 = shalt.err (!%p710_p1)
}
  0x21   :  { %s766_s4 = smov 128   ;;  %s767_s27 = smov 8  }
  0x22   :  { %31 = dma.hbm_to_vmem [thread:$0]  %s922_s2, 2048, %s820_s30, [#allocation3], %s766_s4, %s766_s4, %s767_s27  }
  0x23   :  { %s768_s9 = smov [#allocation7]   ;;  %s714_s13 = scalar_lea.hbm %s926_s6, 1024 }
  0x24   :  { %s51_s10 = sshll.u32 %s768_s9, 4  ;;  %p715_p2 = scmp.ne.s32.totalorder %s926_s6, %s714_s13  ;;  %s52_s10 = int_to_ptr.vmem [resolvable:$true] %s51_s10 }
  0x25   :  { %p718_p3 = scmp.lt.u32.totalorder %s714_s13, %s926_s6 }
  0x27   :  { %p720_p4 = pnand %p718_p3, %p715_p2 }
  0x29   :  { %723 = shalt.err (!%p720_p4)
}
  0x2a   :  { %s724_s18 = scalar_lea.vmem %s52_s10, 1024  ;;  %p729_p6 = scmp.lt.s32.totalorder %s52_s10, %s52_s10 }
  0x2b   :  { %p725_p5 = scmp.ne.s32.totalorder %s52_s10, %s724_s18  ;;  %p730_p7 = scmp.lt.s32.totalorder %s724_s18, %s724_s18 }
  0x2d   :  { %p731_p8 = por %p730_p7, %p729_p6 }
  0x2f   :  { %p732_p9 = pnand %p731_p8, %p725_p5 }
  0x31   :  { %735 = shalt.err (!%p732_p9)
}
  0x32   :  { %s769_s2 = smov 64   ;;  %s770_s30 = smov 4  }
  0x33   :  { %57 = dma.hbm_to_vmem [thread:$0]  %s926_s6, 1024, %s52_s10, [#allocation6], %s769_s2, %s769_s2, %s770_s30  }
  0x34   :  { %758 = dma.done.wait [#allocation3], 2048  }
  0x35   :  { %759 = vsyncadd [#allocation3], 4294965248 }
  0x36   :  { %760 = dma.done.wait [#allocation6], 1536  }
  0x37   :  { %761 = vsyncadd [#allocation6], 4294965760  ;;  %v771_v0 = vmov 0   ;;  %v634_v1 = vld [vmem:[#allocation2 + $0x4] ss:$8 sps:$4 sm:$0xff]   ;;  %v234_v22 = vld [vmem:[#allocation5 + $0x18] sm:$0xff]  ;;  %v91_v25 = vlaneseq }
  0x38   :  { %213 = vmatprep.mubr.bf16.mxu0 %v771_v0  ;;  %633 = vset.pattern.permute.xlu0 %v771_v0  ;;  %v636_v2 = vld [vmem:[#allocation2] ss:$8 sps:$4 sm:$0xff]   ;;  %v637_v3 = vld [vmem:[#allocation2 + $0x14] ss:$8 sps:$4 sm:$0xff]   ;;  %v639_v4 = vld [vmem:[#allocation2 + $0x10] ss:$8 sps:$4 sm:$0xff]  }
  0x39   :  { %181 = vmatprep.subr.bf16.mxu0 %v634_v1  ;;  %v640_v5 = vld [vmem:[#allocation2 + $0x24] ss:$8 sps:$4 sm:$0xff]   ;;  %v642_v6 = vld [vmem:[#allocation2 + $0x20] ss:$8 sps:$4 sm:$0xff]   ;;  %v643_v7 = vld [vmem:[#allocation2 + $0x34] ss:$8 sps:$4 sm:$0xff]   ;;  %332 = vmatprep.subr.mxu1 %v234_v22 }
  0x3a   :  { %182 = vmatpush1.bf16.msra.mxu0 %v636_v2  ;;  %v645_v8 = vld [vmem:[#allocation2 + $0x30] ss:$8 sps:$4 sm:$0xff]   ;;  %v646_v9 = vld [vmem:[#allocation2 + $0x44] ss:$8 sps:$4 sm:$0xff]   ;;  %v648_v11 = vld [vmem:[#allocation2 + $0x40] ss:$8 sps:$4 sm:$0xff]  }
  0x3b   :  { %183 = vmatprep.subr.bf16.mxu0 %v637_v3  ;;  %v72_v10 = vld [vmem:[%s921_s1] sm:$0xff]  ;;  %v649_v12 = vld [vmem:[#allocation2 + $0x54] ss:$8 sps:$4 sm:$0xff]   ;;  %v651_v13 = vld [vmem:[#allocation2 + $0x50] ss:$8 sps:$4 sm:$0xff]   ;;  %v772_v24 = vmov 0.0  }
  0x3c   :  { %226 = vperm.xlu0 %633, %v72_v10   ;;  %v652_v14 = vld [vmem:[#allocation2 + $0x64] ss:$8 sps:$4 sm:$0xff]   ;;  %v654_v15 = vld [vmem:[#allocation2 + $0x60] ss:$8 sps:$4 sm:$0xff]   ;;  %v655_v16 = vld [vmem:[#allocation2 + $0x74] ss:$8 sps:$4 sm:$0xff]   ;;  %396 = vmatprep.mubr.f32.mxu1 %v772_v24 }
  0x3d   :  { %v657_v17 = vld [vmem:[#allocation2 + $0x70] ss:$8 sps:$4 sm:$0xff]   ;;  %v70_v18 = vld [vmem:[%s920_s0] sm:$0xff]  ;;  %v232_v20 = vld [vmem:[#allocation5 + $0x8] sm:$0xff]  ;;  %v872_v26 = vand.u32 127, %v91_v25  ;;  %vm257_vm0 = vcmask 64512  }
  0x3e   :  { %184 = vmatpush1.bf16.msra.mxu0 %v639_v4  ;;  %v71_v19 = vpack.c.bf16 %v70_v18, %v70_v18  ;;  %v231_v21 = vld [vmem:[#allocation5] sm:$0xff]  ;;  %v233_v23 = vld [vmem:[#allocation5 + $0x10] sm:$0xff]  ;;  %v876_v29 = vshrl.u32 %v91_v25, 7  ;;  %v659_v39 = vld [vmem:[#allocation7 + $0x8] sm:$0xff]   ;;  %vm773_vm3 = vmmov 0  }
  0x3f   :  { %185 = vmatprep.subr.bf16.mxu0 %v640_v5  ;;  %333 = vmatpush1.msra.mxu1 %v233_v23  ;;  %v882_v31 = vld [vmem:[%s923_s3] sm:$0x3]  ;;  %vm407_vm2 = vcmp.lt.s32.totalorder %v872_v26, 48  ;;  %v660_v45 = vld [vmem:[#allocation7 + $0x10] sm:$0xff]   ;;  %v661_v46 = vld [vmem:[#allocation7 + $0x18] sm:$0xff]   ;;  %vm535_vm4 = vcmp.lt.s32.totalorder %v872_v26, 24 }
  0x40   :  { %602 = vmatprep.subr.bf16.mxu1 %v772_v24  ;;  %v93_v30 = vsub.s32 0, %v876_v29  ;;  %v658_v38 = vld [vmem:[#allocation7] sm:$0xff]   ;;  %v247_v50 = vsub.s32 2, %v876_v29  ;;  %v251_v51 = vsub.s32 3, %v876_v29  ;;  %v663_v52 = vld [vmem:[#allocation7 + $0x28] sm:$0xff]   ;;  %v664_v60 = vld [vmem:[#allocation7 + $0x30] sm:$0xff]  }
  0x41   :  { %v662_v48 = vld [vmem:[#allocation7 + $0x20] sm:$0xff]   ;;  %v665_v61 = vld [vmem:[#allocation7 + $0x38] sm:$0xff]   ;;  %v97_v2 = vsub.s32 1, %v876_v29 }
  0x42   :  { %186 = vmatpush1.bf16.msra.mxu0 %v642_v6  ;;  %v94_v32 = vrot.slane %v882_v31, %v93_v30  ;;  %v235_v49 = vld [vmem:[%s925_s5] sm:$0xf] }
  0x43   :  { %187 = vmatprep.subr.bf16.mxu0 %v643_v7  ;;  %v248_v53 = vrot.slane %v235_v49, %v247_v50  ;;  %v252_v55 = vrot.slane %v235_v49, %v251_v51  ;;  %v240_v1 = vrot.slane %v235_v49, %v93_v30  ;;  %v244_v4 = vrot.slane %v235_v49, %v97_v2 }
  0x46   :  { %188 = vmatpush1.bf16.msra.mxu0 %v645_v8 }
  0x47   :  { %189 = vmatprep.subr.bf16.mxu0 %v646_v9 }
  0x4a   :  { %190 = vmatpush1.bf16.msra.mxu0 %v648_v11 }
  0x4b   :  { %191 = vmatprep.subr.bf16.mxu0 %v649_v12  ;;  %v584_v12 = vld [vmem:[%s927_s7] ss:$0 sm:$0xff]  ;;  %s774_s7 = smov [#allocation8]  }
  0x4c   :  { %s555_s26 = sshll.u32 %s774_s7, 4  ;;  %s556_s26 = int_to_ptr.vmem [resolvable:$true] %s555_s26 }
  0x4d   :  { %s736_s4 = scalar_lea.vmem %s556_s26, 128  ;;  %p741_p11 = scmp.lt.s32.totalorder %s556_s26, %s556_s26 }
  0x4e   :  { %192 = vmatpush1.bf16.msra.mxu0 %v651_v13  ;;  %p737_p10 = scmp.ne.s32.totalorder %s556_s26, %s736_s4  ;;  %p742_p12 = scmp.lt.s32.totalorder %s736_s4, %s736_s4 }
  0x4f   :  { %193 = vmatprep.subr.bf16.mxu0 %v652_v14 }
  0x50   :  { %p743_p13 = por %p742_p12, %p741_p11 }
  0x52   :  { %194 = vmatpush1.bf16.msra.mxu0 %v654_v15  ;;  %p744_p0 = pnand %p743_p13, %p737_p10 }
  0x53   :  { %195 = vmatprep.subr.bf16.mxu0 %v655_v16 }
  0x56   :  { %196 = vmatpush1.bf16.msra.mxu0 %v657_v17 }
  0x57   :  { %261 = vmatprep.subr.mxu0 %v232_v20 }
  0x59   :  { %214 = vmatmul.mubr.bf16.vlgmr.msra.gmra.mrb[0].mxu0 %v71_v19 }
  0x5a   :  { %262 = vmatpush1.msra.mxu0 %v231_v21  ;;  %325 = vmatprep.mubr.f32.mxu0 %v772_v24 }
  0xbb   :  { %v227_v27 = vpop.permute.xlu0 %226 }
  0xbc   :  { %vm228_vm1 = vcmp.eq.s32.totalorder %v872_v26, %v227_v27 }
  0xbd   :  { %v581_v28 = vsel %vm228_vm1, 1.0, %v772_v24 }
  0xbe   :  { %582 = vmatmul.mubr.msk.f32.vlgmr.msra.gmra.mrb[4].mxu0 %vm257_vm0, %v581_v28  ;;  %583 = vmatmul.mubr.msk.f32.vlgmr.msra.gmra.mrb[0].mxu1 %vm257_vm0, %v581_v28  ;;  %v98_v28 = vrot.slane %v882_v31, %v97_v2 }
  0xbf   :  { %603 = vmatpush3.bf16.msra.mxu1 %v658_v38  ;;  %618 = vmatprep.mubr.msk.bf16.mxu1 %vm773_vm3, %v772_v24 }
  0xc0   :  { %604 = vmatprep.subr.bf16.mxu1 %v772_v24 }
  0xc3   :  { %605 = vmatpush3.bf16.msra.mxu1 %v659_v39 }
  0xc4   :  { %606 = vmatprep.subr.bf16.mxu1 %v772_v24 }
  0xc7   :  { %607 = vmatpush3.bf16.msra.mxu1 %v660_v45 }
  0xc8   :  { %608 = vmatprep.subr.bf16.mxu1 %v772_v24 }
  0xcb   :  { %609 = vmatpush3.bf16.msra.mxu1 %v661_v46 }
  0xcc   :  { %610 = vmatprep.subr.bf16.mxu1 %v772_v24 }
  0xcf   :  { %611 = vmatpush3.bf16.msra.mxu1 %v662_v48 }
  0xd0   :  { %612 = vmatprep.subr.bf16.mxu1 %v772_v24 }
  0xd3   :  { %613 = vmatpush3.bf16.msra.mxu1 %v663_v52 }
  0xd4   :  { %614 = vmatprep.subr.bf16.mxu1 %v772_v24 }
  0xd7   :  { %615 = vmatpush3.bf16.msra.mxu1 %v664_v60 }
  0xd8   :  { %616 = vmatprep.subr.bf16.mxu1 %v772_v24 }
  0xdb   :  { %617 = vmatpush3.bf16.msra.mxu1 %v665_v61 }
 0x12c   :  { %v215_v33 = vpop.f32.mrb[0].mxu0 }
 0x12d   :  { %v216_v34 = vadd.f32 %v215_v33, %v94_v32  ;;  %v885_v35 = vpop.f32.mrb[1].mxu0 }
 0x12e   :  { %v219_v36 = vpop.f32.mrb[2].mxu0  ;;  %v218_v32 = vadd.f32 %v885_v35, %v98_v28 }
 0x12f   :  { %v220_v37 = vpop.f32.mrb[3].mxu0  ;;  %403 = vadd.xlane.f32.xlu0 %v216_v34 }
 0x191   :  { %v327_v47 = vpop.f32.mrb[4].mxu0  ;;  %v398_v54 = vpop.f32.mrb[0].mxu1 }
 0x192   :  { %v329_v56 = vpop.f32.mrb[5].mxu0  ;;  %v400_v57 = vpop.f32.mrb[1].mxu1  ;;  %v399_v58 = vadd.f32 %v398_v54, %v248_v53  ;;  %v328_v3 = vadd.f32 %v327_v47, %v240_v1 }
 0x193   :  { %v401_v59 = vadd.f32 %v400_v57, %v252_v55  ;;  %v330_v8 = vadd.f32 %v329_v56, %v244_v4 }
 0x1bc   :  { %v404_v40 = vpop.xlane.xlu0 %403 }
 0x1bd   :  { %v405_v41 = vmul.f32 0.020833334, %v404_v40 }
 0x1bf   :  { %v406_v42 = vsub.f32 %v216_v34, %v405_v41 }
 0x1c1   :  { %v408_v43 = vsel %vm407_vm2, %v406_v42, 0.0 }
 0x1c2   :  { %v409_v44 = vmul.f32 %v408_v43, %v408_v43 }
 0x1c4   :  { %410 = vadd.xlane.f32.xlu1 %v409_v44 }
 0x251   :  { %v411_v62 = vpop.xlane.xlu1 %410 }
 0x252   :  { %v412_v63 = vmul.f32 0.020833334, %v411_v62 }
 0x254   :  { %v413_v0 = vadd.f32 1e-05, %v412_v63 }
 0x256   :  { %666 = vrsqrt.f32 %v413_v0 }
 0x260   :  { %v667_v5 = vpop.eup %666 }
 0x261   :  { %v415_v6 = vmul.f32 %v667_v5, %v408_v43 }
 0x263   :  { %v416_v7 = vmul.f32 %v415_v6, %v328_v3 }
 0x265   :  { %v417_v9 = vadd.f32 %v416_v7, %v330_v8 }
 0x267   :  { %v418_v10 = vmax.f32 %v417_v9, 0.0 }
 0x269   :  { %v419_v11 = vpack.c.bf16 %v418_v10, %v418_v10 }
 0x26b   :  { %619 = vmatmul.mubr.bf16.vlgmr.msra.gmra.mrb[4].mxu1 %v419_v11 }
 0x33e   :  { %v525_v13 = vpop.f32.mrb[4].mxu1 }
 0x33f   :  { %v526_v14 = vadd.f32 %v584_v12, %v525_v13  ;;  %v620_v15 = vpop.f32.mrb[5].mxu1 }
 0x340   :  { %v528_v16 = vpop.f32.mrb[6].mxu1 }
 0x341   :  { %531 = vadd.xlane.f32.xlu1 %v526_v14  ;;  %v621_v17 = vpop.f32.mrb[7].mxu1 }
 0x3ce   :  { %v532_v18 = vpop.xlane.xlu1 %531 }
 0x3cf   :  { %v533_v19 = vmul.f32 0.041666668, %v532_v18 }
 0x3d1   :  { %v534_v20 = vsub.f32 %v526_v14, %v533_v19 }
 0x3d3   :  { %v536_v21 = vsel %vm535_vm4, %v534_v20, 0.0 }
 0x3d4   :  { %v537_v22 = vmul.f32 %v536_v21, %v536_v21 }
 0x3d6   :  { %538 = vadd.xlane.f32.xlu1 %v537_v22 }
 0x463   :  { %v539_v23 = vpop.xlane.xlu1 %538 }
 0x464   :  { %v540_v24 = vmul.f32 0.041666668, %v539_v23 }
 0x466   :  { %v541_v25 = vadd.f32 1e-05, %v540_v24 }
 0x468   :  { %668 = vrsqrt.f32 %v541_v25 }
 0x472   :  { %v669_v27 = vpop.eup %668 }
 0x473   :  { %v543_v29 = vmul.f32 %v669_v27, %v536_v21 }
 0x475   :  { %v544_v30 = vmul.f32 %v543_v29, %v399_v58 }
 0x477   :  { %v545_v33 = vadd.f32 %v544_v30, %v401_v59 }
 0x479   :  { %v547_v34 = vadd.f32 %v545_v33, %v218_v32 }
 0x47b   :  { %548 = vst [vmem:[#allocation8] sm:$0xff] %v547_v34 }
 0x47c   :  { %747 = shalt.err (!%p744_p0)
}
 0x47d   :  { %s748_s29 = scalar_lea.hbm %s928_s8, 128 }
 0x47e   :  { %p749_p1 = scmp.ne.s32.totalorder %s928_s8, %s748_s29  ;;  %p752_p2 = scmp.lt.u32.totalorder %s748_s29, %s928_s8 }
 0x480   :  { %p754_p3 = pnand %p752_p2, %p749_p1 }
 0x482   :  { %757 = shalt.err (!%p754_p3)
}
 0x483   :  { %558 = dma.vmem_to_hbm [thread:$0]  %s556_s26, 128, %s928_s8, [#allocation4]  }
 0x484   :  { %762 = dma.done.wait [#allocation4], 128  }
 0x485   :  { %763 = vsyncadd [#allocation4], 4294967168 }
 0x486   :  { %562 = vsyncpa [#allocation3], 1 }
 0x487   :  { %563 = vsyncpa [#allocation6], 1 }
 0x488   :  { %564 = vsyncpa [#allocation4], 1 }

// kernel: tpu_custom_call.1
= control target key start
LH: loop header
LB: loop body
LE: loop exit
PB: predicated region body
PF: predicated region fallthrough
CT: control target
= control target key end

     0   :  { %13 = vsyncpa [#allocation3], 0  ;;  %s920_s0 = inlined_call_operand.vmem [shape: f32[8,128], index: 0, kind: input, shape index: {}]   ;;  %s921_s1 = inlined_call_operand.vmem [shape: s32[8,1], index: 1, kind: input, shape index: {}]   ;;  %s922_s2 = inlined_call_operand.hbm [shape: bf16[128,256], index: 2, kind: input, shape index: {}]   ;;  %s923_s3 = inlined_call_operand.vmem [shape: f32[1,256], index: 3, kind: input, shape index: {}]   ;;  %s924_s4 = inlined_call_operand.hbm [shape: f32[8,512], index: 4, kind: input, shape index: {}]   ;;  %s925_s5 = inlined_call_operand.vmem [shape: f32[1,512], index: 5, kind: input, shape index: {}]   ;;  %s926_s6 = inlined_call_operand.hbm [shape: bf16[128,128], index: 6, kind: input, shape index: {}]   ;;  %s927_s7 = inlined_call_operand.vmem [shape: f32[1,128], index: 7, kind: input, shape index: {}]   ;;  %s928_s8 = inlined_call_operand.hbm [shape: f32[8,128], index: 8, kind: output, shape index: {}]  }
   0x1   :  { %14 = vsyncpa [#allocation6], 0 }
   0x2   :  { %15 = vsyncpa [#allocation4], 0  ;;  %s764_s27 = smov [#allocation5]   ;;  %s765_s29 = smov [#allocation2]  }
   0x3   :  { %s40_s28 = sshll.u32 %s764_s27, 4  ;;  %s25_s30 = sshll.u32 %s765_s29, 4  ;;  %s41_s28 = int_to_ptr.vmem [resolvable:$true] %s40_s28  ;;  %s820_s30 = int_to_ptr.vmem [resolvable:$true] %s25_s30 }
   0x4   :  { %s670_s11 = scalar_lea.hbm %s924_s4, 512 }
   0x5   :  { %p671_p0 = scmp.ne.s32.totalorder %s924_s4, %s670_s11  ;;  %p674_p1 = scmp.lt.u32.totalorder %s670_s11, %s924_s4 }
   0x7   :  { %p676_p2 = pnand %p674_p1, %p671_p0 }
   0x9   :  { %679 = shalt.err (!%p676_p2)
}
   0xa   :  { %s680_s16 = scalar_lea.vmem %s41_s28, 512  ;;  %p685_p4 = scmp.lt.s32.totalorder %s41_s28, %s41_s28 }
   0xb   :  { %p681_p3 = scmp.ne.s32.totalorder %s41_s28, %s680_s16  ;;  %p686_p5 = scmp.lt.s32.totalorder %s680_s16, %s680_s16 }
   0xd   :  { %p687_p6 = por %p686_p5, %p685_p4 }
   0xf   :  { %p688_p7 = pnand %p687_p6, %p681_p3 }
  0x11   :  { %691 = shalt.err (!%p688_p7)
}
  0x12   :  { %43 = dma.hbm_to_vmem [thread:$0]  %s924_s4, 512, %s41_s28, [#allocation6]  }
  0x13   :  { %s692_s21 = scalar_lea.hbm %s922_s2, 2048 }
  0x14   :  { %p693_p8 = scmp.ne.s32.totalorder %s922_s2, %s692_s21  ;;  %p696_p9 = scmp.lt.u32.totalorder %s692_s21, %s922_s2 }
  0x16   :  { %p698_p10 = pnand %p696_p9, %p693_p8 }
  0x18   :  { %701 = shalt.err (!%p698_p10)
}
  0x19   :  { %s702_s26 = scalar_lea.vmem %s820_s30, 2048  ;;  %p707_p12 = scmp.lt.s32.totalorder %s820_s30, %s820_s30 }
  0x1a   :  { %p703_p11 = scmp.ne.s32.totalorder %s820_s30, %s702_s26  ;;  %p708_p13 = scmp.lt.s32.totalorder %s702_s26, %s702_s26 }
  0x1c   :  { %p709_p0 = por %p708_p13, %p707_p12 }
  0x1e   :  { %p710_p1 = pnand %p709_p0, %p703_p11 }
  0x20   :  { %713 = shalt.err (!%p710_p1)
}
  0x21   :  { %s766_s4 = smov 128   ;;  %s767_s27 = smov 8  }
  0x22   :  { %31 = dma.hbm_to_vmem [thread:$0]  %s922_s2, 2048, %s820_s30, [#allocation3], %s766_s4, %s766_s4, %s767_s27  }
  0x23   :  { %s768_s9 = smov [#allocation7]   ;;  %s714_s13 = scalar_lea.hbm %s926_s6, 1024 }
  0x24   :  { %s51_s10 = sshll.u32 %s768_s9, 4  ;;  %p715_p2 = scmp.ne.s32.totalorder %s926_s6, %s714_s13  ;;  %s52_s10 = int_to_ptr.vmem [resolvable:$true] %s51_s10 }
  0x25   :  { %p718_p3 = scmp.lt.u32.totalorder %s714_s13, %s926_s6 }
  0x27   :  { %p720_p4 = pnand %p718_p3, %p715_p2 }
  0x29   :  { %723 = shalt.err (!%p720_p4)
}
  0x2a   :  { %s724_s18 = scalar_lea.vmem %s52_s10, 1024  ;;  %p729_p6 = scmp.lt.s32.totalorder %s52_s10, %s52_s10 }
  0x2b   :  { %p725_p5 = scmp.ne.s32.totalorder %s52_s10, %s724_s18  ;;  %p730_p7 = scmp.lt.s32.totalorder %s724_s18, %s724_s18 }
  0x2d   :  { %p731_p8 = por %p730_p7, %p729_p6 }
  0x2f   :  { %p732_p9 = pnand %p731_p8, %p725_p5 }
  0x31   :  { %735 = shalt.err (!%p732_p9)
}
  0x32   :  { %s769_s2 = smov 64   ;;  %s770_s30 = smov 4  }
  0x33   :  { %57 = dma.hbm_to_vmem [thread:$0]  %s926_s6, 1024, %s52_s10, [#allocation6], %s769_s2, %s769_s2, %s770_s30  }
  0x34   :  { %758 = dma.done.wait [#allocation3], 2048  }
  0x35   :  { %759 = vsyncadd [#allocation3], 4294965248 }
  0x36   :  { %760 = dma.done.wait [#allocation6], 1536  }
  0x37   :  { %761 = vsyncadd [#allocation6], 4294965760  ;;  %v771_v0 = vmov 0   ;;  %v634_v1 = vld [vmem:[#allocation2 + $0x4] ss:$8 sps:$4 sm:$0xff]   ;;  %v234_v22 = vld [vmem:[#allocation5 + $0x18] sm:$0xff]  ;;  %v91_v25 = vlaneseq }
  0x38   :  { %213 = vmatprep.mubr.bf16.mxu0 %v771_v0  ;;  %633 = vset.pattern.permute.xlu0 %v771_v0  ;;  %v636_v2 = vld [vmem:[#allocation2] ss:$8 sps:$4 sm:$0xff]   ;;  %v637_v3 = vld [vmem:[#allocation2 + $0x14] ss:$8 sps:$4 sm:$0xff]   ;;  %v639_v4 = vld [vmem:[#allocation2 + $0x10] ss:$8 sps:$4 sm:$0xff]  }
  0x39   :  { %181 = vmatprep.subr.bf16.mxu0 %v634_v1  ;;  %v640_v5 = vld [vmem:[#allocation2 + $0x24] ss:$8 sps:$4 sm:$0xff]   ;;  %v642_v6 = vld [vmem:[#allocation2 + $0x20] ss:$8 sps:$4 sm:$0xff]   ;;  %v643_v7 = vld [vmem:[#allocation2 + $0x34] ss:$8 sps:$4 sm:$0xff]   ;;  %332 = vmatprep.subr.mxu1 %v234_v22 }
  0x3a   :  { %182 = vmatpush1.bf16.msra.mxu0 %v636_v2  ;;  %v645_v8 = vld [vmem:[#allocation2 + $0x30] ss:$8 sps:$4 sm:$0xff]   ;;  %v646_v9 = vld [vmem:[#allocation2 + $0x44] ss:$8 sps:$4 sm:$0xff]   ;;  %v648_v11 = vld [vmem:[#allocation2 + $0x40] ss:$8 sps:$4 sm:$0xff]  }
  0x3b   :  { %183 = vmatprep.subr.bf16.mxu0 %v637_v3  ;;  %v72_v10 = vld [vmem:[%s921_s1] sm:$0xff]  ;;  %v649_v12 = vld [vmem:[#allocation2 + $0x54] ss:$8 sps:$4 sm:$0xff]   ;;  %v651_v13 = vld [vmem:[#allocation2 + $0x50] ss:$8 sps:$4 sm:$0xff]   ;;  %v772_v24 = vmov 0.0  }
  0x3c   :  { %226 = vperm.xlu0 %633, %v72_v10   ;;  %v652_v14 = vld [vmem:[#allocation2 + $0x64] ss:$8 sps:$4 sm:$0xff]   ;;  %v654_v15 = vld [vmem:[#allocation2 + $0x60] ss:$8 sps:$4 sm:$0xff]   ;;  %v655_v16 = vld [vmem:[#allocation2 + $0x74] ss:$8 sps:$4 sm:$0xff]   ;;  %396 = vmatprep.mubr.f32.mxu1 %v772_v24 }
  0x3d   :  { %v657_v17 = vld [vmem:[#allocation2 + $0x70] ss:$8 sps:$4 sm:$0xff]   ;;  %v70_v18 = vld [vmem:[%s920_s0] sm:$0xff]  ;;  %v232_v20 = vld [vmem:[#allocation5 + $0x8] sm:$0xff]  ;;  %v872_v26 = vand.u32 127, %v91_v25  ;;  %vm257_vm0 = vcmask 64512  }
  0x3e   :  { %184 = vmatpush1.bf16.msra.mxu0 %v639_v4  ;;  %v71_v19 = vpack.c.bf16 %v70_v18, %v70_v18  ;;  %v231_v21 = vld [vmem:[#allocation5] sm:$0xff]  ;;  %v233_v23 = vld [vmem:[#allocation5 + $0x10] sm:$0xff]  ;;  %v876_v29 = vshrl.u32 %v91_v25, 7  ;;  %v659_v39 = vld [vmem:[#allocation7 + $0x8] sm:$0xff]   ;;  %vm773_vm3 = vmmov 0  }
  0x3f   :  { %185 = vmatprep.subr.bf16.mxu0 %v640_v5  ;;  %333 = vmatpush1.msra.mxu1 %v233_v23  ;;  %v882_v31 = vld [vmem:[%s923_s3] sm:$0x3]  ;;  %vm407_vm2 = vcmp.lt.s32.totalorder %v872_v26, 48  ;;  %v660_v45 = vld [vmem:[#allocation7 + $0x10] sm:$0xff]   ;;  %v661_v46 = vld [vmem:[#allocation7 + $0x18] sm:$0xff]   ;;  %vm535_vm4 = vcmp.lt.s32.totalorder %v872_v26, 24 }
  0x40   :  { %602 = vmatprep.subr.bf16.mxu1 %v772_v24  ;;  %v93_v30 = vsub.s32 0, %v876_v29  ;;  %v658_v38 = vld [vmem:[#allocation7] sm:$0xff]   ;;  %v247_v50 = vsub.s32 2, %v876_v29  ;;  %v251_v51 = vsub.s32 3, %v876_v29  ;;  %v663_v52 = vld [vmem:[#allocation7 + $0x28] sm:$0xff]   ;;  %v664_v60 = vld [vmem:[#allocation7 + $0x30] sm:$0xff]  }
  0x41   :  { %v662_v48 = vld [vmem:[#allocation7 + $0x20] sm:$0xff]   ;;  %v665_v61 = vld [vmem:[#allocation7 + $0x38] sm:$0xff]   ;;  %v97_v2 = vsub.s32 1, %v876_v29 }
  0x42   :  { %186 = vmatpush1.bf16.msra.mxu0 %v642_v6  ;;  %v94_v32 = vrot.slane %v882_v31, %v93_v30  ;;  %v235_v49 = vld [vmem:[%s925_s5] sm:$0xf] }
  0x43   :  { %187 = vmatprep.subr.bf16.mxu0 %v643_v7  ;;  %v248_v53 = vrot.slane %v235_v49, %v247_v50  ;;  %v252_v55 = vrot.slane %v235_v49, %v251_v51  ;;  %v240_v1 = vrot.slane %v235_v49, %v93_v30  ;;  %v244_v4 = vrot.slane %v235_v49, %v97_v2 }
  0x46   :  { %188 = vmatpush1.bf16.msra.mxu0 %v645_v8 }
  0x47   :  { %189 = vmatprep.subr.bf16.mxu0 %v646_v9 }
  0x4a   :  { %190 = vmatpush1.bf16.msra.mxu0 %v648_v11 }
  0x4b   :  { %191 = vmatprep.subr.bf16.mxu0 %v649_v12  ;;  %v584_v12 = vld [vmem:[%s927_s7] ss:$0 sm:$0xff]  ;;  %s774_s7 = smov [#allocation8]  }
  0x4c   :  { %s555_s26 = sshll.u32 %s774_s7, 4  ;;  %s556_s26 = int_to_ptr.vmem [resolvable:$true] %s555_s26 }
  0x4d   :  { %s736_s4 = scalar_lea.vmem %s556_s26, 128  ;;  %p741_p11 = scmp.lt.s32.totalorder %s556_s26, %s556_s26 }
  0x4e   :  { %192 = vmatpush1.bf16.msra.mxu0 %v651_v13  ;;  %p737_p10 = scmp.ne.s32.totalorder %s556_s26, %s736_s4  ;;  %p742_p12 = scmp.lt.s32.totalorder %s736_s4, %s736_s4 }
  0x4f   :  { %193 = vmatprep.subr.bf16.mxu0 %v652_v14 }
  0x50   :  { %p743_p13 = por %p742_p12, %p741_p11 }
  0x52   :  { %194 = vmatpush1.bf16.msra.mxu0 %v654_v15  ;;  %p744_p0 = pnand %p743_p13, %p737_p10 }
  0x53   :  { %195 = vmatprep.subr.bf16.mxu0 %v655_v16 }
  0x56   :  { %196 = vmatpush1.bf16.msra.mxu0 %v657_v17 }
  0x57   :  { %261 = vmatprep.subr.mxu0 %v232_v20 }
  0x59   :  { %214 = vmatmul.mubr.bf16.vlgmr.msra.gmra.mrb[0].mxu0 %v71_v19 }
  0x5a   :  { %262 = vmatpush1.msra.mxu0 %v231_v21  ;;  %325 = vmatprep.mubr.f32.mxu0 %v772_v24 }
  0xbb   :  { %v227_v27 = vpop.permute.xlu0 %226 }
  0xbc   :  { %vm228_vm1 = vcmp.eq.s32.totalorder %v872_v26, %v227_v27 }
  0xbd   :  { %v581_v28 = vsel %vm228_vm1, 1.0, %v772_v24 }
  0xbe   :  { %582 = vmatmul.mubr.msk.f32.vlgmr.msra.gmra.mrb[4].mxu0 %vm257_vm0, %v581_v28  ;;  %583 = vmatmul.mubr.msk.f32.vlgmr.msra.gmra.mrb[0].mxu1 %vm257_vm0, %v581_v28  ;;  %v98_v28 = vrot.slane %v882_v31, %v97_v2 }
  0xbf   :  { %603 = vmatpush3.bf16.msra.mxu1 %v658_v38  ;;  %618 = vmatprep.mubr.msk.bf16.mxu1 %vm773_vm3, %v772_v24 }
  0xc0   :  { %604 = vmatprep.subr.bf16.mxu1 %v772_v24 }
  0xc3   :  { %605 = vmatpush3.bf16.msra.mxu1 %v659_v39 }
  0xc4   :  { %606 = vmatprep.subr.bf16.mxu1 %v772_v24 }
  0xc7   :  { %607 = vmatpush3.bf16.msra.mxu1 %v660_v45 }
  0xc8   :  { %608 = vmatprep.subr.bf16.mxu1 %v772_v24 }
  0xcb   :  { %609 = vmatpush3.bf16.msra.mxu1 %v661_v46 }
  0xcc   :  { %610 = vmatprep.subr.bf16.mxu1 %v772_v24 }
  0xcf   :  { %611 = vmatpush3.bf16.msra.mxu1 %v662_v48 }
  0xd0   :  { %612 = vmatprep.subr.bf16.mxu1 %v772_v24 }
  0xd3   :  { %613 = vmatpush3.bf16.msra.mxu1 %v663_v52 }
  0xd4   :  { %614 = vmatprep.subr.bf16.mxu1 %v772_v24 }
  0xd7   :  { %615 = vmatpush3.bf16.msra.mxu1 %v664_v60 }
  0xd8   :  { %616 = vmatprep.subr.bf16.mxu1 %v772_v24 }
  0xdb   :  { %617 = vmatpush3.bf16.msra.mxu1 %v665_v61 }
 0x12c   :  { %v215_v33 = vpop.f32.mrb[0].mxu0 }
 0x12d   :  { %v216_v34 = vadd.f32 %v215_v33, %v94_v32  ;;  %v885_v35 = vpop.f32.mrb[1].mxu0 }
 0x12e   :  { %v219_v36 = vpop.f32.mrb[2].mxu0  ;;  %v218_v32 = vadd.f32 %v885_v35, %v98_v28 }
 0x12f   :  { %v220_v37 = vpop.f32.mrb[3].mxu0  ;;  %403 = vadd.xlane.f32.xlu0 %v216_v34 }
 0x191   :  { %v327_v47 = vpop.f32.mrb[4].mxu0  ;;  %v398_v54 = vpop.f32.mrb[0].mxu1 }
 0x192   :  { %v329_v56 = vpop.f32.mrb[5].mxu0  ;;  %v400_v57 = vpop.f32.mrb[1].mxu1  ;;  %v399_v58 = vadd.f32 %v398_v54, %v248_v53  ;;  %v328_v3 = vadd.f32 %v327_v47, %v240_v1 }
 0x193   :  { %v401_v59 = vadd.f32 %v400_v57, %v252_v55  ;;  %v330_v8 = vadd.f32 %v329_v56, %v244_v4 }
 0x1bc   :  { %v404_v40 = vpop.xlane.xlu0 %403 }
 0x1bd   :  { %v405_v41 = vmul.f32 0.020833334, %v404_v40 }
 0x1bf   :  { %v406_v42 = vsub.f32 %v216_v34, %v405_v41 }
 0x1c1   :  { %v408_v43 = vsel %vm407_vm2, %v406_v42, 0.0 }
 0x1c2   :  { %v409_v44 = vmul.f32 %v408_v43, %v408_v43 }
 0x1c4   :  { %410 = vadd.xlane.f32.xlu1 %v409_v44 }
 0x251   :  { %v411_v62 = vpop.xlane.xlu1 %410 }
 0x252   :  { %v412_v63 = vmul.f32 0.020833334, %v411_v62 }
 0x254   :  { %v413_v0 = vadd.f32 1e-05, %v412_v63 }
 0x256   :  { %666 = vrsqrt.f32 %v413_v0 }
 0x260   :  { %v667_v5 = vpop.eup %666 }
 0x261   :  { %v415_v6 = vmul.f32 %v667_v5, %v408_v43 }
 0x263   :  { %v416_v7 = vmul.f32 %v415_v6, %v328_v3 }
 0x265   :  { %v417_v9 = vadd.f32 %v416_v7, %v330_v8 }
 0x267   :  { %v418_v10 = vmax.f32 %v417_v9, 0.0 }
 0x269   :  { %v419_v11 = vpack.c.bf16 %v418_v10, %v418_v10 }
 0x26b   :  { %619 = vmatmul.mubr.bf16.vlgmr.msra.gmra.mrb[4].mxu1 %v419_v11 }
 0x33e   :  { %v525_v13 = vpop.f32.mrb[4].mxu1 }
 0x33f   :  { %v526_v14 = vadd.f32 %v584_v12, %v525_v13  ;;  %v620_v15 = vpop.f32.mrb[5].mxu1 }
 0x340   :  { %v528_v16 = vpop.f32.mrb[6].mxu1 }
 0x341   :  { %531 = vadd.xlane.f32.xlu1 %v526_v14  ;;  %v621_v17 = vpop.f32.mrb[7].mxu1 }
 0x3ce   :  { %v532_v18 = vpop.xlane.xlu1 %531 }
 0x3cf   :  { %v533_v19 = vmul.f32 0.041666668, %v532_v18 }
 0x3d1   :  { %v534_v20 = vsub.f32 %v526_v14, %v533_v19 }
 0x3d3   :  { %v536_v21 = vsel %vm535_vm4, %v534_v20, 0.0 }
 0x3d4   :  { %v537_v22 = vmul.f32 %v536_v21, %v536_v21 }
 0x3d6   :  { %538 = vadd.xlane.f32.xlu1 %v537_v22 }
 0x463   :  { %v539_v23 = vpop.xlane.xlu1 %538 }
 0x464   :  { %v540_v24 = vmul.f32 0.041666668, %v539_v23 }
 0x466   :  { %v541_v25 = vadd.f32 1e-05, %v540_v24 }
 0x468   :  { %668 = vrsqrt.f32 %v541_v25 }
 0x472   :  { %v669_v27 = vpop.eup %668 }
 0x473   :  { %v543_v29 = vmul.f32 %v669_v27, %v536_v21 }
 0x475   :  { %v544_v30 = vmul.f32 %v543_v29, %v399_v58 }
 0x477   :  { %v545_v33 = vadd.f32 %v544_v30, %v401_v59 }
 0x479   :  { %v547_v34 = vadd.f32 %v545_v33, %v218_v32 }
 0x47b   :  { %548 = vst [vmem:[#allocation8] sm:$0xff] %v547_v34 }
 0x47c   :  { %747 = shalt.err (!%p744_p0)
}
 0x47d   :  { %s748_s29 = scalar_lea.hbm %s928_s8, 128 }
 0x47e   :  { %p749_p1 = scmp.ne.s32.totalorder %s928_s8, %s748_s29  ;;  %p752_p2 = scmp.lt.u32.totalorder %s748_s29, %s928_s8 }
 0x480   :  { %p754_p3 = pnand %p752_p2, %p749_p1 }
 0x482   :  { %757 = shalt.err (!%p754_p3)
}
 0x483   :  { %558 = dma.vmem_to_hbm [thread:$0]  %s556_s26, 128, %s928_s8, [#allocation4]  }
 0x484   :  { %762 = dma.done.wait [#allocation4], 128  }
 0x485   :  { %763 = vsyncadd [#allocation4], 4294967168 }
 0x486   :  { %562 = vsyncpa [#allocation3], 1 }
 0x487   :  { %563 = vsyncpa [#allocation6], 1 }
 0x488   :  { %564 = vsyncpa [#allocation4], 1 }

</bundles_post_ra>
